<compile_context>
chip_gen: v6e
topology: v6e:2x2x1
jax: 0.10.0
libtpu: 0.0.40
codegen_flags: <defaults>
</compile_context>

<pallas_src>
import jax
import jax.numpy as jnp
from jax.experimental import pallas as pl
from jax.experimental.pallas import tpu as pltpu

HIDDEN = 30


def _round_up(n, m):
    return ((n + m - 1) // m) * m


def anet_kernel(xt_ref, w1_ref, b1_ref, w2_ref, b2_ref, ot_ref):
    # fc1: h^T = W1 @ x^T -> (hidden, tb); f32 accumulation on the MXU.
    h = jnp.dot(w1_ref[...], xt_ref[...], preferred_element_type=jnp.float32)
    h = jnp.maximum(h + b1_ref[...], 0.0)          # bias (hidden,1) broadcasts over lanes; ReLU
    # out: y^T = W2 @ h^T -> (a_dim, tb)
    y = jnp.dot(w2_ref[...], h.astype(w2_ref.dtype), preferred_element_type=jnp.float32)
    ot_ref[...] = jnp.tanh(y + b2_ref[...]).astype(ot_ref.dtype)


def anet_forward_t(x_t, w1, b1, w2, b2, *, tile_b=65536, out_dtype=jnp.float32,
                   small_batch_threshold=256):
    """Feature-major ANet forward.

    x_t: (s_dim, B) activations, batch on the last (lane) axis.
    w1:  (hidden, s_dim)  b1: (hidden, 1)   -- PyTorch nn.Linear native (out, in) layout.
    w2:  (a_dim, hidden)  b2: (a_dim, 1)
    Returns (a_dim, B) actions in `out_dtype`.  x_t / w1 / w2 may be f32 or bf16;
    accumulation and the bias/ReLU/tanh epilogue are f32.
    """
    s_dim, B = x_t.shape
    hidden = w1.shape[0]
    a_dim = w2.shape[0]
    assert w1.shape == (hidden, s_dim) and b1.shape == (hidden, 1)
    assert w2.shape == (a_dim, hidden) and b2.shape == (a_dim, 1)

    # Tiny batches: kernel launch + one grid step of fixed overhead dwarfs the
    # 4->30->2 MLP; plain fused XLA is faster and simpler.
    if B <= small_batch_threshold:
        h = jnp.maximum(jnp.dot(w1, x_t, preferred_element_type=jnp.float32) + b1, 0.0)
        y = jnp.dot(w2, h.astype(w2.dtype), preferred_element_type=jnp.float32) + b2
        return jnp.tanh(y).astype(out_dtype)

    # Batch tile: multiple of 128 lanes, capped at tile_b, sized so there are
    # >= 4 grid steps when B allows (megacore sharding on v7x needs >= 2).
    tb = min(tile_b, _round_up(pl.cdiv(B, 4), 128))
    tb = max(tb, 128)
    grid_b = pl.cdiv(B, tb)   # ragged last block: row-wise math, OOB writes masked

    param_bytes = sum(int(a.size) * a.dtype.itemsize for a in (w1, b1, w2, b2))
    cost = pl.CostEstimate(
        flops=2 * B * (s_dim * hidden + hidden * a_dim),
        transcendentals=B * a_dim,                               # tanh
        bytes_accessed=int(x_t.size) * x_t.dtype.itemsize        # activations in
        + param_bytes                                            # resident params
        + B * a_dim * jnp.dtype(out_dtype).itemsize,             # output
    )

    out_t = pl.pallas_call(
        anet_kernel,
        out_shape=jax.ShapeDtypeStruct((a_dim, B), out_dtype),
        grid=(grid_b,),
        in_specs=[
            pl.BlockSpec((s_dim, tb), lambda i: (0, i)),        # batch-tiled x^T (lane-dense)
            pl.BlockSpec((hidden, s_dim), lambda i: (0, 0)),    # weights stay resident
            pl.BlockSpec((hidden, 1), lambda i: (0, 0)),
            pl.BlockSpec((a_dim, hidden), lambda i: (0, 0)),
            pl.BlockSpec((a_dim, 1), lambda i: (0, 0)),
        ],
        out_specs=pl.BlockSpec((a_dim, tb), lambda i: (0, i)),
        compiler_params=pltpu.CompilerParams(
            dimension_semantics=("parallel",),                  # batch axis -> megacore
            # ~30 MiB worst-case live VMEM at tb=65536 (double-buffered x^T/y^T
            # + f32 hidden temporaries); 48 MiB cap is > v5e's 16 MiB scoped
            # default and < v7x's 64 MiB physical per-TC VMEM.
            vmem_limit_bytes=48 * 1024 * 1024,
        ),
        cost_estimate=cost,
    )(x_t, w1, b1, w2, b2)
    return out_t


def init_params(key, s_dim, a_dim, hidden=HIDDEN):
    """Deterministic init mirroring the PyTorch module: weights ~ Normal(0, 0.1);
    biases ~ Uniform(-1/sqrt(fan_in), 1/sqrt(fan_in)) (nn.Linear default bias init).
    Weights kept in PyTorch-native (out, in) layout; biases as (out, 1) columns."""
    k1, k2, k3, k4 = jax.random.split(key, 4)
    w1 = 0.1 * jax.random.normal(k1, (hidden, s_dim), dtype=jnp.float32)
    w2 = 0.1 * jax.random.normal(k2, (a_dim, hidden), dtype=jnp.float32)
    bnd1 = 1.0 / jnp.sqrt(jnp.float32(s_dim))
    bnd2 = 1.0 / jnp.sqrt(jnp.float32(hidden))
    b1 = jax.random.uniform(k3, (hidden, 1), dtype=jnp.float32, minval=-bnd1, maxval=bnd1)
    b2 = jax.random.uniform(k4, (a_dim, 1), dtype=jnp.float32, minval=-bnd2, maxval=bnd2)
    return w1, b1, w2, b2


if __name__ == "__main__":
    key = jax.random.PRNGKey(0)
    kx, kp, kb, kc = jax.random.split(key, 4)

    S_DIM, A_DIM = 4, 2
    w1, b1, w2, b2 = init_params(kp, S_DIM, A_DIM)

    def ref_forward_t(x_t):
        h = jnp.maximum(w1 @ x_t + b1, 0.0)
        return jnp.tanh(w2 @ h + b2)

    # 1) Tiny batch (B=2): plain-XLA fallback path (launch overhead would dominate).
    xt_small = jax.random.normal(kx, (S_DIM, 2), dtype=jnp.float32)
    out_small = anet_forward_t(xt_small, w1, b1, w2, b2)
    jax.block_until_ready(out_small)
    assert out_small.shape == (A_DIM, 2)
    assert jnp.allclose(out_small, ref_forward_t(xt_small), atol=1e-5, rtol=1e-5)

    # 2) Non-tile-multiple batch: Pallas path, lane-dense 384-row tiles, 3 grid
    #    steps, ragged last block handled by Pallas (no jnp.pad / output slice).
    xt_mid = jax.random.normal(kb, (S_DIM, 1030), dtype=jnp.float32)
    out_mid = anet_forward_t(xt_mid, w1, b1, w2, b2)
    jax.block_until_ready(out_mid)
    assert out_mid.shape == (A_DIM, 1030)
    assert jnp.allclose(out_mid, ref_forward_t(xt_mid), atol=1e-5, rtol=1e-5)

    # 3) Large batch, f32: full 65536-lane tiles, 5 grid steps (megacore-splittable),
    #    ragged tail of 7 rows.
    B_BIG = 262151
    xt_big = jax.random.normal(kc, (S_DIM, B_BIG), dtype=jnp.float32)
    out_big = anet_forward_t(xt_big, w1, b1, w2, b2)
    jax.block_until_ready(out_big)
    assert out_big.shape == (A_DIM, B_BIG)
    assert jnp.allclose(out_big, ref_forward_t(xt_big), atol=1e-5, rtol=1e-5)

    # 4) Same batch with bf16 activations/weights and bf16 output (halves HBM
    #    traffic on this memory-bound net); f32 accumulation and f32 biases stay
    #    inside the kernel, so compare loosely against the f32 reference.
    out_bf16 = anet_forward_t(
        xt_big.astype(jnp.bfloat16),
        w1.astype(jnp.bfloat16), b1,
        w2.astype(jnp.bfloat16), b2,
        out_dtype=jnp.bfloat16,
    )
    jax.block_until_ready(out_bf16)
    assert out_bf16.shape == (A_DIM, B_BIG)
    assert jnp.allclose(out_bf16.astype(jnp.float32), ref_forward_t(xt_big),
                        atol=4e-2, rtol=4e-2)

    print("KERNEL_OK")
</pallas_src>

<mosaic_0001>
module attributes {stable_mosaic.version = 11 : i64} {
  func.func @anet_kernel(%arg0: i32, %arg1: memref<4x384xf32, #tpu.memory_space<vmem>>, %arg2: memref<30x4xf32, #tpu.memory_space<vmem>>, %arg3: memref<30x1xf32, #tpu.memory_space<vmem>>, %arg4: memref<2x30xf32, #tpu.memory_space<vmem>>, %arg5: memref<2x1xf32, #tpu.memory_space<vmem>>, %arg6: memref<2x384xf32, #tpu.memory_space<vmem>>) attributes {dimension_semantics = [#tpu.dimension_semantics<parallel>], iteration_bounds = array<i64: 3>, scalar_prefetch = 0 : i64, scratch_operands = 0 : i64, tpu.core_type = #tpu.core_type<tc>, window_params = [{transform_indices = @transform_0, window_bounds = array<i64: 4, 384>}, {pipeline_mode = #tpu.pipeline_mode<synchronous>, transform_indices = @transform_1, window_bounds = array<i64: 30, 4>}, {pipeline_mode = #tpu.pipeline_mode<synchronous>, transform_indices = @transform_2, window_bounds = array<i64: 30, 1>}, {pipeline_mode = #tpu.pipeline_mode<synchronous>, transform_indices = @transform_3, window_bounds = array<i64: 2, 30>}, {pipeline_mode = #tpu.pipeline_mode<synchronous>, transform_indices = @transform_4, window_bounds = array<i64: 2, 1>}, {transform_indices = @transform_5, window_bounds = array<i64: 2, 384>}]} {
    %c0 = arith.constant 0 : index
    %c0_0 = arith.constant 0 : index
    %0 = vector.load %arg2[%c0, %c0_0] : memref<30x4xf32, #tpu.memory_space<vmem>>, vector<30x4xf32>
    %c0_1 = arith.constant 0 : index
    %c0_2 = arith.constant 0 : index
    %1 = vector.load %arg1[%c0_1, %c0_2] : memref<4x384xf32, #tpu.memory_space<vmem>>, vector<4x384xf32>
    %cst = arith.constant dense<0.000000e+00> : vector<30x384xf32>
    %2 = tpu.matmul %0, %1, %cst {dimension_numbers = #tpu.dot_dimension_numbers<[1], [0], [0], [1], [0, 0, 1, 1], [], []>} : vector<30x4xf32>, vector<4x384xf32>, vector<30x384xf32> -> vector<30x384xf32>
    %c0_3 = arith.constant 0 : index
    %c0_4 = arith.constant 0 : index
    %3 = vector.load %arg3[%c0_3, %c0_4] : memref<30x1xf32, #tpu.memory_space<vmem>>, vector<30x1xf32>
    %4 = vector.broadcast %3 : vector<30x1xf32> to vector<30x384xf32>
    %5 = arith.addf %2, %4 : vector<30x384xf32>
    %cst_5 = arith.constant 0.000000e+00 : f32
    %6 = vector.broadcast %cst_5 : f32 to vector<30x384xf32>
    %7 = arith.maximumf %5, %6 : vector<30x384xf32>
    %c0_6 = arith.constant 0 : index
    %c0_7 = arith.constant 0 : index
    %8 = vector.load %arg4[%c0_6, %c0_7] : memref<2x30xf32, #tpu.memory_space<vmem>>, vector<2x30xf32>
    %cst_8 = arith.constant dense<0.000000e+00> : vector<2x384xf32>
    %9 = tpu.matmul %8, %7, %cst_8 {dimension_numbers = #tpu.dot_dimension_numbers<[1], [0], [0], [1], [0, 0, 1, 1], [], []>} : vector<2x30xf32>, vector<30x384xf32>, vector<2x384xf32> -> vector<2x384xf32>
    %c0_9 = arith.constant 0 : index
    %c0_10 = arith.constant 0 : index
    %10 = vector.load %arg5[%c0_9, %c0_10] : memref<2x1xf32, #tpu.memory_space<vmem>>, vector<2x1xf32>
    %11 = vector.broadcast %10 : vector<2x1xf32> to vector<2x384xf32>
    %12 = arith.addf %9, %11 : vector<2x384xf32>
    %13 = math.tanh %12 : vector<2x384xf32>
    %c0_11 = arith.constant 0 : index
    %c0_12 = arith.constant 0 : index
    %14 = vector.load %arg6[%c0_11, %c0_12] : memref<2x384xf32, #tpu.memory_space<vmem>>, vector<2x384xf32>
    tpu.vector_store %arg6[%c0_11, %c0_12], %13 {strides = array<i32>} : memref<2x384xf32, #tpu.memory_space<vmem>>, vector<2x384xf32>,
    return
  }
  func.func @transform_0(%arg0: i32) -> (i32, i32) {
    %c0_i32 = arith.constant 0 : i32
    %c0_i32_0 = arith.constant 0 : i32
    return %c0_i32, %arg0 : i32, i32
  }
  func.func @transform_1(%arg0: i32) -> (i32, i32) {
    %c0_i32 = arith.constant 0 : i32
    %c0_i32_0 = arith.constant 0 : i32
    %c0_i32_1 = arith.constant 0 : i32
    return %c0_i32, %c0_i32_0 : i32, i32
  }
  func.func @transform_2(%arg0: i32) -> (i32, i32) {
    %c0_i32 = arith.constant 0 : i32
    %c0_i32_0 = arith.constant 0 : i32
    %c0_i32_1 = arith.constant 0 : i32
    return %c0_i32, %c0_i32_0 : i32, i32
  }
  func.func @transform_3(%arg0: i32) -> (i32, i32) {
    %c0_i32 = arith.constant 0 : i32
    %c0_i32_0 = arith.constant 0 : i32
    %c0_i32_1 = arith.constant 0 : i32
    return %c0_i32, %c0_i32_0 : i32, i32
  }
  func.func @transform_4(%arg0: i32) -> (i32, i32) {
    %c0_i32 = arith.constant 0 : i32
    %c0_i32_0 = arith.constant 0 : i32
    %c0_i32_1 = arith.constant 0 : i32
    return %c0_i32, %c0_i32_0 : i32, i32
  }
  func.func @transform_5(%arg0: i32) -> (i32, i32) {
    %c0_i32 = arith.constant 0 : i32
    %c0_i32_0 = arith.constant 0 : i32
    return %c0_i32, %arg0 : i32, i32
  }
}

</mosaic_0001>

<bundles_post_ra>
// kernel: tpu_custom_call.1
= control target key start
LH: loop header
LB: loop body
LE: loop exit
PB: predicated region body
PF: predicated region fallthrough
CT: control target
= control target key end

     0   :  { %10 = vsyncpa [#allocation3], 0  ;;  %s1074_s0 = inlined_call_operand.vmem [shape: f32[4,1030], index: 0, kind: input, shape index: {}]   ;;  %s1075_s1 = inlined_call_operand.vmem [shape: f32[30,4], index: 1, kind: input, shape index: {}]   ;;  %s1076_s2 = inlined_call_operand.vmem [shape: f32[30,1], index: 2, kind: input, shape index: {}]   ;;  %s1077_s3 = inlined_call_operand.vmem [shape: f32[2,30], index: 3, kind: input, shape index: {}]   ;;  %s1078_s4 = inlined_call_operand.vmem [shape: f32[2,1], index: 4, kind: input, shape index: {}]   ;;  %s1079_s5 = inlined_call_operand.hbm [shape: f32[2,1030], index: 5, kind: output, shape index: {}]  }
   0x1   :  { %12 = vsyncpa [#allocation3 + $0x1], 0  ;;  %s931_s18 = smov 0   ;;  %s933_s19 = smov 0  }
   0x2   :  { %s935_s20 = smov 0   ;;  %s937_s21 = smov 0  }
   0x3 LB: > { %s952_s22 = sadd.s32 4294967295, %s894_s21   ;;  %s725_s23 = sadd.s32 4294967294, %s894_s21   ;;  %s894_s21 = sphi %s937_s21, %s1085_s21   ;;  %s890_s20 = sphi %s935_s20, %s1084_s20   ;;  %s886_s19 = sphi %s933_s19, %s1083_s19   ;;  %s882_s18 = sphi %s931_s18, %s1082_s18  }
   0x4   : > { %s956_s24 = sadd.s32 1, %s894_s21   ;;  %s135_s25 = sadd.s32 1, %s890_s20 }
   0x5   : > { %s132_s26 = ssub.s32 %s894_s21, %s956_s24  ;;  %p145_p0 = scmp.ne.s32.totalorder %s890_s20, %s886_s19 }
   0x6   : > { %p133_p1 = scmp.eq.s32.totalorder %s132_s26, 0  ;;  %p146_p2 = scmp.eq.s32.totalorder %s952_s22, 2 }
   0x7   : > { %p151_p3 = scmp.ne.s32.totalorder %s886_s19, %s882_s18  ;;  %p152_p4 = scmp.eq.s32.totalorder %s725_s23, 2 }
   0x8   : > { %s967_s27 = scalar_select %p133_p1, %s890_s20, %s135_s25  }
   0x9   : > { %p969_p5 = por %p146_p2, %p145_p0  ;;  %p973_p6 = por %p152_p4, %p151_p3 }
   0xa   : > { %p728_p7 = scmp.ge.s32.totalorder %s894_s21, 1  ;;  %p191_p8 = scmp.lt.s32.totalorder %s894_s21, 4 }
   0xc   : > { %p192_p9 = pnand %p728_p7, %p191_p8 }
   0xd   : > { %s219_s30 = smul.u32 (!%p192_p9), 3, %s952_s22  ;;  %s900_s8 = smov (!%p192_p9), [#allocation2]  }
   0xe   : > { %195 = sbr.rel (%p192_p9) target bundleno = 471 (0x1d7), region = 40  ;;  %s838_s9 = sshll.u32 (!%p192_p9), %s900_s8, 4  ;;  %s839_s9 = int_to_ptr.vmem [resolvable:$false] %s838_s9 }
   0xf   : > { %p220_p10 = scmp.lt.s32.totalorder (!%p192_p9), %s219_s30, 8  ;;  %s749_s16 = smul.u32 (!%p192_p9), 96, %s952_s22 }
  0x10   : > { %s840_s22 = scalar_lea.vmem (!%p192_p9), %s839_s9, 192 }
  0x11   : > { %s664_s6 = scalar_lea.hbm (!%p192_p9), %s1079_s5, %s749_s16 }
  0x13   : > { %v896_v0 = vmov 0.0   ;;  %v233_v1 = vld [vmem:[%s1076_s2 + $0x8] sm:$0xff]  ;;  %v897_v2 = vmov 0   ;;  %v235_v3 = vld [vmem:[%s1076_s2 + $0x18] sm:$0x3f]  ;;  %s1087_s30 = smov (!%p220_p10, %s219_s30), 8 }
  0x14   : > { %343 = vmatprep.mubr.f32.mxu0 %v896_v0  ;;  %361 = vmatprep.mubr.f32.mxu1 %v896_v0  ;;  %v232_v4 = vld [vmem:[%s1076_s2] sm:$0xff]  ;;  %v234_v5 = vld [vmem:[%s1076_s2 + $0x10] sm:$0xff]  ;;  %s729_s14 = sshll.u32 %s1087_s30, 2  ;;  %vm272_vm0 = vcmask 1043456   ;;  %vm259_vm1 = vcmask 31744   ;;  %v227_v12 = vld [vmem:[%s1075_s1 + $0x8] sm:$0xff] }
  0x15   : > { %826 = vset.pattern.permute.xlu1 %v897_v2  ;;  %825 = vset.pattern.permute.xlu0 %v897_v2  ;;  %s223_s17 = scalar_lea.vmem %s1074_s0, %s729_s14  ;;  %v226_v8 = vld [vmem:[%s1075_s1] sm:$0xff]  ;;  %v229_v9 = vld [vmem:[%s1075_s1 + $0x18] sm:$0x3f]  ;;  %v228_v13 = vld [vmem:[%s1075_s1 + $0x10] sm:$0xff]  ;;  %vm898_vm2 = vmmov 0   ;;  %vm476_vm3 = vcmask 1045504  }
  0x16   : > { %243 = vperm.xlu1 %826, %v233_v1   ;;  %253 = vperm.xlu0 %825, %v235_v3   ;;  %v230_v6 = vld [vmem:[%s223_s17] sm:$0xff]  ;;  %v231_v10 = vld [vmem:[%s223_s17 + $0x8] sm:$0xf]  ;;  %vm472_vm4 = vcmask 244736   ;;  %v899_v63 = vmov 1983009808   ;;  %v637_v1 = vlaneseq }
  0x17   : > { %v258_v7 = vcombine.high %v230_v6, %v230_v6  ;;  %v466_v11 = vld [vmem:[%s1078_s4] sm:$0x3]  ;;  %s216_s14 = sand.u32 1, %s886_s19  }
  0x18   : > { %v465_v53 = vld [vmem:[%s1077_s3] sm:$0x3]  ;;  %s781_s15 = smul.u32 6, %s216_s14  ;;  %v638_v3 = vshrl.u32 %v637_v1, 7  ;;  %s652_s30 = scalar_lea.sflag [#allocation3], %s216_s14 }
  0x19   : > { %730 = vmatprep.subr.msk.mxu0 %vm272_vm0, %v258_v7  ;;  %779 = vmatprep.subr.msk.mxu1 %vm272_vm0, %v258_v7 }
  0x1a   : > { %238 = vperm.xlu1 %826, %v232_v4   ;;  %248 = vperm.xlu0 %825, %v234_v5   ;;  %s218_s17 = scalar_lea.vmem [#allocation2], %s781_s15 }
  0x1b   : > { %731 = vmatpush1.msk.msra.mxu0 %vm272_vm0, %v230_v6  ;;  %780 = vmatpush1.msk.msra.mxu1 %vm272_vm0, %v230_v6  ;;  %s666_s23 = sshll.u32 %s218_s17, 4  ;;  %s667_s23 = int_to_ptr.vmem [resolvable:$true] %s666_s23 }
  0x1c   : > { %732 = vmatmul.mubr.msk.f32.vlgmr.msra.gmra.mxu0 %vm259_vm1, %v226_v8  ;;  %735 = vmatmul.mubr.msk.f32.vlgmr.msra.gmra.mxu1 %vm259_vm1, %v229_v9  ;;  %s834_s7 = scalar_lea.vmem %s667_s23, 96  ;;  %p841_p0 = scmp.lt.s32.totalorder %s667_s23, %s839_s9 }
  0x1d   : > { %760 = vmatprep.subr.msk.mxu1 %vm272_vm0, %v231_v10  ;;  %349 = vmatprep.mubr.f32.mxu0 %v896_v0  ;;  %p835_p11 = scmp.ne.s32.totalorder %s667_s23, %s834_s7  ;;  %p842_p1 = scmp.lt.s32.totalorder %s840_s22, %s834_s7 }
  0x1e   : > { %761 = vmatpush3.msk.msra.mxu1 %vm272_vm0, %v231_v10  ;;  %762 = vmatprep.mubr.msk.f32.mxu1 %vm259_vm1, %v226_v8 }
  0x1f   : > { %469 = vperm.xlu0 %825, %v466_v11   ;;  %768 = vmatprep.subr.mxu0 %v896_v0  ;;  %p836_p12 = pnand %p835_p11, %p969_p5  ;;  %p843_p2 = por %p842_p1, %p841_p0 }
  0x20   : > { %733 = vmatmul.mubr.msk.f32.gmra.mxu0 %vm259_vm1, %v227_v12  ;;  %763 = vmatmul.mubr.msk.f32.vlgmr.msra.gmra.mxu1 %vm259_vm1, %v227_v12 }
  0x21   : > { %355 = vmatprep.mubr.f32.mxu0 %v896_v0  ;;  %765 = vmatprep.mubr.msk.f32.mxu1 %vm259_vm1, %v228_v13  ;;  %p837_p13 = pneg %p836_p12 }
  0x23   : > { %p844_p3 = pnand %p843_p2, %p837_p13 }
  0x24   : > { %734 = vmatmul.mubr.msk.f32.gmra.mxu0 %vm259_vm1, %v228_v13  ;;  %766 = vmatmul.mubr.msk.f32.gmra.mxu1 %vm259_vm1, %v229_v9 }
  0x25   : > { %550 = vmatprep.mubr.f32.mxu1 %v896_v0  ;;  %776 = vmatprep.mubr.msk.f32.mxu0 %vm898_vm2, %v896_v0 }
  0x91   : > { %v254_v14 = vpop.permute.xlu0 %253  ;;  %v244_v24 = vpop.permute.xlu1 %243 }
  0x95   : > { %v249_v30 = vpop.permute.xlu0 %248  ;;  %v239_v36 = vpop.permute.xlu1 %238 }
  0x9a   : > { %v470_v55 = vpop.permute.xlu0 %469 }
  0xdc   : > { %v345_v15 = vpop.f32.mrf.mxu0  ;;  %v363_v16 = vpop.f32.mrf.mxu1 }
  0xdd   : > { %v364_v17 = vadd.f32 %v363_v16, %v254_v14  ;;  %v346_v46 = vadd.f32 %v345_v15, %v239_v36 }
  0xde   : > { %v347_v18 = vpop.f32.mrf.mxu0  ;;  %v365_v19 = vpop.f32.mrf.mxu1 }
  0xdf   : > { %v366_v20 = vadd.f32 %v365_v19, %v254_v14  ;;  %v462_v21 = vmax.f32 %v364_v17, 0.0  ;;  %v348_v42 = vadd.f32 %v347_v18, %v239_v36  ;;  %v453_v54 = vmax.f32 %v346_v46, 0.0 }
  0xe0   : > { %v351_v22 = vpop.f32.mrf.mxu0  ;;  %v764_v23 = vpop.f32.mrf.mxu1 }
  0xe1   : > { %v463_v25 = vmax.f32 %v366_v20, 0.0  ;;  %v440_v32 = vadd.f32 %v764_v23, %v244_v24  ;;  %v352_v41 = vadd.f32 %v351_v22, %v244_v24  ;;  %v454_v51 = vmax.f32 %v348_v42, 0.0 }
  0xe2   : > { %v353_v26 = vpop.f32.mrf.mxu0  ;;  %v434_v27 = vpop.f32.mrf.mxu1 }
  0xe3   : > { %741 = vmatprep.subr.msk.mxu1 %vm476_vm3, %v463_v25  ;;  %v354_v37 = vadd.f32 %v353_v26, %v244_v24  ;;  %v435_v43 = vadd.f32 %v434_v27, %v239_v36  ;;  %v458_v48 = vmax.f32 %v440_v32, 0.0  ;;  %v456_v50 = vmax.f32 %v352_v41, 0.0 }
  0xe4   : > { %v357_v28 = vpop.f32.mrf.mxu0  ;;  %v767_v29 = vpop.f32.mrf.mxu1  ;;  %742 = vmatpush1.msk.msra.mxu1 %vm476_vm3, %v462_v21 }
  0xe5   : > { %v450_v31 = vadd.f32 %v767_v29, %v254_v14  ;;  %v358_v33 = vadd.f32 %v357_v28, %v249_v30  ;;  %v457_v49 = vmax.f32 %v354_v37, 0.0  ;;  %v455_v52 = vmax.f32 %v435_v43, 0.0 }
  0xe6   : > { %v359_v34 = vpop.f32.mrf.mxu0  ;;  %v444_v35 = vpop.f32.mrf.mxu1 }
  0xe7   : > { %v464_v38 = vmax.f32 %v450_v31, 0.0  ;;  %v360_v39 = vadd.f32 %v359_v34, %v249_v30  ;;  %v445_v40 = vadd.f32 %v444_v35, %v249_v30  ;;  %v459_v47 = vmax.f32 %v358_v33, 0.0 }
  0xe9   : > { %v460_v44 = vmax.f32 %v360_v39, 0.0  ;;  %v461_v45 = vmax.f32 %v445_v40, 0.0  ;;  %769 = vmatpush3.msk.msra.mxu0 %vm476_vm3, %v464_v38 }
  0xea   : > { %770 = vmatprep.subr.mxu0 %v896_v0 }
  0xeb   : > { %512 = vmatprep.subr.mxu1 %v460_v44  ;;  %771 = vmatpush3.msra.mxu0 %v461_v45 }
  0xec   : > { %513 = vmatpush1.msra.mxu1 %v459_v47  ;;  %772 = vmatprep.subr.mxu0 %v896_v0 }
  0xed   : > { %514 = vmatprep.subr.mxu1 %v457_v49  ;;  %773 = vmatpush3.msra.mxu0 %v458_v48 }
  0xee   : > { %515 = vmatpush1.msra.mxu1 %v456_v50  ;;  %774 = vmatprep.subr.mxu0 %v896_v0  ;;  %v635_v0 = vunpack.c.l.s4 %v899_v63 }
  0xef   : > { %516 = vmatprep.subr.mxu1 %v454_v51  ;;  %775 = vmatpush3.msra.mxu0 %v455_v52 }
  0xf0   : > { %517 = vmatpush1.msra.mxu1 %v453_v54  ;;  %777 = vmatmul.mubr.msk.f32.vlgmr.msra.gmra.mxu0 %vm472_vm4, %v465_v53  ;;  %v636_v2 = vunpack.c.0.s8 %v635_v0 }
  0xf1   : > { %743 = vmatmul.mubr.msk.f32.vlgmr.msra.gmra.mxu1 %vm472_vm4, %v465_v53 }
  0xf2   : > { %v639_v6 = vsub.s32 %v636_v2, %v638_v3 }
 0x1b0   : > { %v623_v56 = vpop.f32.mrf.mxu0 }
 0x1b1   : > { %v624_v57 = vadd.f32 %v623_v56, %v470_v55  ;;  %v552_v58 = vpop.f32.mrf.mxu1 }
 0x1b2   : > { %v553_v59 = vadd.f32 %v552_v58, %v470_v55  ;;  %v778_v60 = vpop.f32.mrf.mxu0 }
 0x1b3   : > { %v554_v61 = vpop.f32.mrf.mxu1  ;;  %828 = vtanh.f32 %v624_v57 }
 0x1b4   : > { %v555_v62 = vadd.f32 %v554_v61, %v470_v55  ;;  %830 = vtanh.f32 %v553_v59 }
 0x1b6   : > { %832 = vtanh.f32 %v555_v62 }
 0x1c0   : > { %v829_v4 = vpop.eup %828 }
 0x1c1   : > { %v831_v5 = vpop.eup %830  ;;  %v647_v10 = vrot.slane %v829_v4, %v639_v6 }
 0x1c3   : > { %v833_v7 = vpop.eup %832 }
 0x1c4   : > { %v633_v8 = vcombine.low %v831_v5, %v833_v7 }
 0x1c6   : > { %v640_v9 = vrot.slane %v633_v8, %v639_v6 }
 0x1c8   : > { %v648_v11 = vcombine.low %v640_v9, %v647_v10 }
 0x1ca   : > { %650 = vst [vmem:[%s218_s17] sm:$0x3f] %v648_v11 }
 0x1cb   : > { %847 = shalt.err (!%p844_p3)
}
 0x1cc   : > { %s848_s10 = scalar_lea.hbm %s664_s6, 96  ;;  %s852_s13 = scalar_lea.hbm %s1079_s5, 288 }
 0x1cd   : > { %p849_p4 = scmp.ne.s32.totalorder %s664_s6, %s848_s10  ;;  %p853_p9 = scmp.lt.s32.totalorder %s664_s6, %s1079_s5 }
 0x1ce   : > { %p854_p10 = scmp.lt.s32.totalorder %s852_s13, %s848_s10 }
 0x1cf   : > { %p850_p7 = pnand %p849_p4, %p969_p5 }
 0x1d0   : > { %p855_p11 = por %p854_p10, %p853_p9 }
 0x1d1   : > { %p851_p8 = pneg %p850_p7 }
 0x1d3   : > { %p856_p12 = pnand %p855_p11, %p851_p8 }
 0x1d5   : > { %859 = shalt.err (!%p856_p12)
}
 0x1d6   : > { %782 = dma.vmem_to_hbm [thread:$0]  (%p969_p5), %s667_s23, 96, %s664_s6, %s652_s30  }
 0x1d7 PF: > { %p788_p13 = scmp.ge.s32.totalorder %s894_s21, 2  ;;  %s678_s16 = sand.u32 1, %s882_s18  }
 0x1d8   : > { %s679_s17 = scalar_lea.sflag [#allocation3], %s678_s16 }
 0x1d9   : > { %p785_p0 = pnand %p788_p13, %p973_p6 }
 0x1db   : > { %p786_p1 = pneg %p785_p0 }
 0x1dd   : > { %877 = dma.done.wait (%p786_p1), %s679_s17, 96  }
 0x1de   : > { %879 = vsyncadd (%p786_p1), %s679_s17, 4294967200  ;;  %p15_p2 = scmp.ge.s32.totalorder %s956_s24, 5   ;;  %s1082_s18 = smov %s886_s19 }
 0x1df   : > { %s1083_s19 = smov %s890_s20  ;;  %s1084_s20 = smov %s967_s27 }
 0x1e0   : > { %s1085_s21 = smov %s956_s24  ;;  %17 = sbr.rel (!%p15_p2) target bundleno = 3 (0x3), region = 75 }
 0x1e5   :  { %684 = vsyncpa [#allocation3], 1 }
 0x1e6   :  { %686 = vsyncpa [#allocation3 + $0x1], 1 }

</bundles_post_ra>
